<compile_context>
chip_gen: v6e
topology: v6e:2x2x1
jax: 0.10.0
libtpu: 0.0.40
codegen_flags: <defaults>
</compile_context>

<pallas_src>
import jax
import jax.numpy as jnp
import numpy as np
from jax.experimental import pallas as pl
from jax.experimental.pallas import tpu as pltpu


# ----------------------------- Pallas kernel ------------------------------ #
def _make_kernel(F):
    """Build the fused SeNet + BiLinearDot kernel for a static feature count F."""

    def kernel(*args):
        feat_refs = args[:F]                       # F x (TB, D) feature tiles
        w1_ref, w2_ref, wb_ref, out_ref = args[F:]

        feats = [r[...].astype(jnp.float32) for r in feat_refs]   # F x (TB, D)
        TB, D = feats[0].shape

        # ---- SeNetLayer: squeeze -> excite -> per-feature rescale --------- #
        z = jnp.concatenate(
            [jnp.mean(f, axis=-1, keepdims=True) for f in feats], axis=-1
        )                                                          # (TB, F)
        a = jnp.maximum(
            jnp.dot(z, w1_ref[...], preferred_element_type=jnp.float32), 0.0
        )                                                          # (TB, Fr)
        g = 2.0 * jax.nn.sigmoid(
            jnp.dot(a, w2_ref[...], preferred_element_type=jnp.float32)
        )                                                          # (TB, F)
        senet = [feats[i] * g[:, i:i + 1] for i in range(F)]       # F x (TB, D)

        # ---- BiLinearDotLayer: shared-W bilinear dot over pairs i<j ------- #
        # Single MXU matmul with M = F*TB (review: maximize M, one MXU call).
        senet_rows = jnp.concatenate(senet, axis=0)                # (F*TB, D)
        t_rows = jnp.dot(
            senet_rows, wb_ref[...], preferred_element_type=jnp.float32
        )                                                          # (F*TB, D)
        t = [t_rows[i * TB:(i + 1) * TB, :] for i in range(F)]     # F x (TB, D)

        # Pair results are reduced to scalars immediately -> only (TB, P)
        # is materialized, never a (TB, P, D) slab.
        # TODO(synk): switch the static double loop to lax.fori_loop once F
        # grows past ~16 (vreg pressure / compile time at production F).
        cols = []
        for i in range(F):
            for j in range(i + 1, F):
                cols.append(
                    jnp.sum(t[i] * senet[j], axis=-1, keepdims=True)  # (TB, 1)
                )
        out_ref[...] = jnp.concatenate(cols, axis=-1).astype(out_ref.dtype)

    return kernel


# ------------------------------- wrapper ----------------------------------- #
def _pick_tb(B, F, D, itemsize=4, vmem_budget_bytes=8 << 20):
    """Batch tile: fits a conservative VMEM budget on every TPU generation
    (v7x has half the VMEM of v5e/v6e) and keeps the grid >= 4 so the
    BlockSpec pipeline double-buffers and both v7x TensorCores get work."""
    P = F * (F - 1) // 2
    # per batch-row live bytes: double-buffered inputs (2*F*D) +
    # senet/t intermediates (~3*F*D) + output (P)
    per_row = (5 * F * D + P) * itemsize
    tb = min(B, max(8, vmem_budget_bytes // per_row))
    if B >= 32:
        tb = min(tb, B // 4)              # grid >= 4
    tb = max(8, (tb // 8) * 8)            # sublane alignment
    while tb > 8 and B % tb != 0:         # even grid, no partial blocks
        tb -= 8
    return tb if B % tb == 0 else B


def senet_bilinear_dot_fusion(feats, w1, w2, wb, *, tb=None):
    """feats: list of F arrays, each (B, D). Returns (B, P) bilinear pair dots."""
    F = len(feats)
    B, D = feats[0].shape
    P = F * (F - 1) // 2
    if tb is None:
        tb = _pick_tb(B, F, D)
    assert B % tb == 0, f"batch {B} must be divisible by tile {tb}"

    feat_specs = [pl.BlockSpec((tb, D), lambda i: (i, 0)) for _ in range(F)]
    param_specs = [
        pl.BlockSpec(w1.shape, lambda i: (0, 0)),   # SENet FC1 (resident)
        pl.BlockSpec(w2.shape, lambda i: (0, 0)),   # SENet FC2 (resident)
        pl.BlockSpec(wb.shape, lambda i: (0, 0)),   # shared bilinear W (resident)
    ]

    cost = pl.CostEstimate(
        flops=2 * B * F * D * D            # bilinear MXU matmul
              + 2 * B * P * D              # pair dot products
              + 4 * B * F * max(1, F // 2),  # tiny SENet FCs
        transcendentals=B * F,             # gate sigmoids
        bytes_accessed=(B * F * D + B * P) * 4
                       + (w1.size + w2.size + wb.size) * 4,
    )

    return pl.pallas_call(
        _make_kernel(F),
        out_shape=jax.ShapeDtypeStruct((B, P), jnp.float32),
        grid_spec=pltpu.PrefetchScalarGridSpec(
            num_scalar_prefetch=0,
            grid=(B // tb,),
            in_specs=feat_specs + param_specs,
            out_specs=pl.BlockSpec((tb, P), lambda i: (i, 0)),
        ),
        compiler_params=pltpu.CompilerParams(
            dimension_semantics=("parallel",),   # batch axis -> megacore + pipeline
        ),
        cost_estimate=cost,
    )(*feats, w1, w2, wb)


# --------------------------- pure-JAX reference ---------------------------- #
def senet_bilinear_dot_reference(feats, w1, w2, wb):
    cat = jnp.stack(feats, axis=1)                       # (B, F, D)
    z = jnp.mean(cat, axis=-1)                           # (B, F)
    a = jnp.maximum(z @ w1, 0.0)
    g = 2.0 * jax.nn.sigmoid(a @ w2)                     # (B, F)
    senet = cat * g[:, :, None]                          # (B, F, D)
    t = jnp.einsum("bfd,de->bfe", senet, wb)             # (B, F, D)
    F = cat.shape[1]
    cols = [jnp.sum(t[:, i, :] * senet[:, j, :], axis=-1)
            for i in range(F) for j in range(i + 1, F)]
    return jnp.stack(cols, axis=-1)                      # (B, P)


def default_hooker(userTrans, userFeature, itemFeature, itemTrans,
                   contextFeature, contextTrans):
    # defaultHooker: chain(userTrans, itemTrans, contextTrans)
    return list(userTrans) + list(itemTrans) + list(contextTrans)


if __name__ == "__main__":
    key = jax.random.PRNGKey(0)
    B, D = 128, 32                     # batch, featureDim
    n_user, n_item, n_ctx = 2, 2, 2    # feature tensors per group
    F = n_user + n_item + n_ctx        # featureNumb = 6
    Fr = max(1, F // 2)                # SENet reduction dim
    P = F * (F - 1) // 2

    ks = jax.random.split(key, 10)

    # feature inputs: each (B, D)
    userTrans = [jax.random.normal(ks[i], (B, D), jnp.float32) for i in range(n_user)]
    itemTrans = [jax.random.normal(ks[2 + i], (B, D), jnp.float32) for i in range(n_item)]
    contextTrans = [jax.random.normal(ks[4 + i], (B, D), jnp.float32) for i in range(n_ctx)]
    userFeature = itemFeature = contextFeature = None    # dropped by defaultHooker

    # deterministic parameter init
    w1 = jax.random.normal(ks[6], (F, Fr), jnp.float32) / np.sqrt(F)   # SENet FC1
    w2 = jax.random.normal(ks[7], (Fr, F), jnp.float32) / np.sqrt(Fr)  # SENet FC2
    wb = jax.random.normal(ks[8], (D, D), jnp.float32) / np.sqrt(D)    # bilinear W

    # hooker (glue, plain Python) -- NO concat; features go straight to the kernel
    feats = default_hooker(userTrans, userFeature, itemFeature,
                           itemTrans, contextFeature, contextTrans)

    out = senet_bilinear_dot_fusion(feats, w1, w2, wb)
    out = jax.block_until_ready(out)

    ref = senet_bilinear_dot_reference(feats, w1, w2, wb)
    np.testing.assert_allclose(np.asarray(out), np.asarray(ref), rtol=1e-4, atol=1e-4)

    print("KERNEL_OK")
</pallas_src>

<mosaic_0001>
module attributes {stable_mosaic.version = 11 : i64} {
  func.func @kernel(%arg0: i32, %arg1: memref<32x32xf32, #tpu.memory_space<vmem>>, %arg2: memref<32x32xf32, #tpu.memory_space<vmem>>, %arg3: memref<32x32xf32, #tpu.memory_space<vmem>>, %arg4: memref<32x32xf32, #tpu.memory_space<vmem>>, %arg5: memref<32x32xf32, #tpu.memory_space<vmem>>, %arg6: memref<32x32xf32, #tpu.memory_space<vmem>>, %arg7: memref<6x3xf32, #tpu.memory_space<vmem>>, %arg8: memref<3x6xf32, #tpu.memory_space<vmem>>, %arg9: memref<32x32xf32, #tpu.memory_space<vmem>>, %arg10: memref<32x15xf32, #tpu.memory_space<vmem>>) attributes {dimension_semantics = [#tpu.dimension_semantics<parallel>], iteration_bounds = array<i64: 4>, scalar_prefetch = 0 : i64, scratch_operands = 0 : i64, tpu.core_type = #tpu.core_type<tc>, window_params = [{transform_indices = @transform_0, window_bounds = array<i64: 32, 32>}, {transform_indices = @transform_1, window_bounds = array<i64: 32, 32>}, {transform_indices = @transform_2, window_bounds = array<i64: 32, 32>}, {transform_indices = @transform_3, window_bounds = array<i64: 32, 32>}, {transform_indices = @transform_4, window_bounds = array<i64: 32, 32>}, {transform_indices = @transform_5, window_bounds = array<i64: 32, 32>}, {pipeline_mode = #tpu.pipeline_mode<synchronous>, transform_indices = @transform_6, window_bounds = array<i64: 6, 3>}, {pipeline_mode = #tpu.pipeline_mode<synchronous>, transform_indices = @transform_7, window_bounds = array<i64: 3, 6>}, {pipeline_mode = #tpu.pipeline_mode<synchronous>, transform_indices = @transform_8, window_bounds = array<i64: 32, 32>}, {transform_indices = @transform_9, window_bounds = array<i64: 32, 15>}]} {
    %c0 = arith.constant 0 : index
    %c0_0 = arith.constant 0 : index
    %0 = vector.load %arg1[%c0, %c0_0] : memref<32x32xf32, #tpu.memory_space<vmem>>, vector<32x32xf32>
    %c0_1 = arith.constant 0 : index
    %c0_2 = arith.constant 0 : index
    %1 = vector.load %arg2[%c0_1, %c0_2] : memref<32x32xf32, #tpu.memory_space<vmem>>, vector<32x32xf32>
    %c0_3 = arith.constant 0 : index
    %c0_4 = arith.constant 0 : index
    %2 = vector.load %arg3[%c0_3, %c0_4] : memref<32x32xf32, #tpu.memory_space<vmem>>, vector<32x32xf32>
    %c0_5 = arith.constant 0 : index
    %c0_6 = arith.constant 0 : index
    %3 = vector.load %arg4[%c0_5, %c0_6] : memref<32x32xf32, #tpu.memory_space<vmem>>, vector<32x32xf32>
    %c0_7 = arith.constant 0 : index
    %c0_8 = arith.constant 0 : index
    %4 = vector.load %arg5[%c0_7, %c0_8] : memref<32x32xf32, #tpu.memory_space<vmem>>, vector<32x32xf32>
    %c0_9 = arith.constant 0 : index
    %c0_10 = arith.constant 0 : index
    %5 = vector.load %arg6[%c0_9, %c0_10] : memref<32x32xf32, #tpu.memory_space<vmem>>, vector<32x32xf32>
    %cst = arith.constant dense<0.000000e+00> : vector<32xf32>
    %6 = vector.multi_reduction <add>, %0, %cst [1] : vector<32x32xf32> to vector<32xf32>
    %7 = vector.shape_cast %6 : vector<32xf32> to vector<32x1xf32>
    %cst_11 = arith.constant 3.200000e+01 : f32
    %8 = vector.broadcast %cst_11 : f32 to vector<32x1xf32>
    %9 = arith.divf %7, %8 : vector<32x1xf32>
    %cst_12 = arith.constant dense<0.000000e+00> : vector<32xf32>
    %10 = vector.multi_reduction <add>, %1, %cst_12 [1] : vector<32x32xf32> to vector<32xf32>
    %11 = vector.shape_cast %10 : vector<32xf32> to vector<32x1xf32>
    %cst_13 = arith.constant 3.200000e+01 : f32
    %12 = vector.broadcast %cst_13 : f32 to vector<32x1xf32>
    %13 = arith.divf %11, %12 : vector<32x1xf32>
    %cst_14 = arith.constant dense<0.000000e+00> : vector<32xf32>
    %14 = vector.multi_reduction <add>, %2, %cst_14 [1] : vector<32x32xf32> to vector<32xf32>
    %15 = vector.shape_cast %14 : vector<32xf32> to vector<32x1xf32>
    %cst_15 = arith.constant 3.200000e+01 : f32
    %16 = vector.broadcast %cst_15 : f32 to vector<32x1xf32>
    %17 = arith.divf %15, %16 : vector<32x1xf32>
    %cst_16 = arith.constant dense<0.000000e+00> : vector<32xf32>
    %18 = vector.multi_reduction <add>, %3, %cst_16 [1] : vector<32x32xf32> to vector<32xf32>
    %19 = vector.shape_cast %18 : vector<32xf32> to vector<32x1xf32>
    %cst_17 = arith.constant 3.200000e+01 : f32
    %20 = vector.broadcast %cst_17 : f32 to vector<32x1xf32>
    %21 = arith.divf %19, %20 : vector<32x1xf32>
    %cst_18 = arith.constant dense<0.000000e+00> : vector<32xf32>
    %22 = vector.multi_reduction <add>, %4, %cst_18 [1] : vector<32x32xf32> to vector<32xf32>
    %23 = vector.shape_cast %22 : vector<32xf32> to vector<32x1xf32>
    %cst_19 = arith.constant 3.200000e+01 : f32
    %24 = vector.broadcast %cst_19 : f32 to vector<32x1xf32>
    %25 = arith.divf %23, %24 : vector<32x1xf32>
    %cst_20 = arith.constant dense<0.000000e+00> : vector<32xf32>
    %26 = vector.multi_reduction <add>, %5, %cst_20 [1] : vector<32x32xf32> to vector<32xf32>
    %27 = vector.shape_cast %26 : vector<32xf32> to vector<32x1xf32>
    %cst_21 = arith.constant 3.200000e+01 : f32
    %28 = vector.broadcast %cst_21 : f32 to vector<32x1xf32>
    %29 = arith.divf %27, %28 : vector<32x1xf32>
    %30 = tpu.concatenate %9, %13, %17, %21, %25, %29 in 1 : vector<32x1xf32>, vector<32x1xf32>, vector<32x1xf32>, vector<32x1xf32>, vector<32x1xf32>, vector<32x1xf32> -> vector<32x6xf32>
    %c0_22 = arith.constant 0 : index
    %c0_23 = arith.constant 0 : index
    %31 = vector.load %arg7[%c0_22, %c0_23] : memref<6x3xf32, #tpu.memory_space<vmem>>, vector<6x3xf32>
    %cst_24 = arith.constant dense<0.000000e+00> : vector<32x3xf32>
    %32 = tpu.matmul %30, %31, %cst_24 {dimension_numbers = #tpu.dot_dimension_numbers<[1], [0], [0], [1], [0, 0, 1, 1], [], []>} : vector<32x6xf32>, vector<6x3xf32>, vector<32x3xf32> -> vector<32x3xf32>
    %cst_25 = arith.constant 0.000000e+00 : f32
    %33 = vector.broadcast %cst_25 : f32 to vector<32x3xf32>
    %34 = arith.maximumf %32, %33 : vector<32x3xf32>
    %c0_26 = arith.constant 0 : index
    %c0_27 = arith.constant 0 : index
    %35 = vector.load %arg8[%c0_26, %c0_27] : memref<3x6xf32, #tpu.memory_space<vmem>>, vector<3x6xf32>
    %cst_28 = arith.constant dense<0.000000e+00> : vector<32x6xf32>
    %36 = tpu.matmul %34, %35, %cst_28 {dimension_numbers = #tpu.dot_dimension_numbers<[1], [0], [0], [1], [0, 0, 1, 1], [], []>} : vector<32x3xf32>, vector<3x6xf32>, vector<32x6xf32> -> vector<32x6xf32>
    %37 = arith.negf %36 : vector<32x6xf32>
    %38 = math.exp %37 : vector<32x6xf32>
    %cst_29 = arith.constant 1.000000e+00 : f32
    %39 = vector.broadcast %cst_29 : f32 to vector<32x6xf32>
    %40 = arith.addf %39, %38 : vector<32x6xf32>
    %41 = arith.divf %39, %40 : vector<32x6xf32>
    %cst_30 = arith.constant 2.000000e+00 : f32
    %42 = vector.broadcast %cst_30 : f32 to vector<32x6xf32>
    %43 = arith.mulf %42, %41 : vector<32x6xf32>
    %44 = vector.extract_strided_slice %43 {offsets = [0, 0], sizes = [32, 1], strides = [1, 1]} : vector<32x6xf32> to vector<32x1xf32>
    %45 = vector.broadcast %44 : vector<32x1xf32> to vector<32x32xf32>
    %46 = arith.mulf %0, %45 : vector<32x32xf32>
    %47 = vector.extract_strided_slice %43 {offsets = [0, 1], sizes = [32, 1], strides = [1, 1]} : vector<32x6xf32> to vector<32x1xf32>
    %48 = vector.broadcast %47 : vector<32x1xf32> to vector<32x32xf32>
    %49 = arith.mulf %1, %48 : vector<32x32xf32>
    %50 = vector.extract_strided_slice %43 {offsets = [0, 2], sizes = [32, 1], strides = [1, 1]} : vector<32x6xf32> to vector<32x1xf32>
    %51 = vector.broadcast %50 : vector<32x1xf32> to vector<32x32xf32>
    %52 = arith.mulf %2, %51 : vector<32x32xf32>
    %53 = vector.extract_strided_slice %43 {offsets = [0, 3], sizes = [32, 1], strides = [1, 1]} : vector<32x6xf32> to vector<32x1xf32>
    %54 = vector.broadcast %53 : vector<32x1xf32> to vector<32x32xf32>
    %55 = arith.mulf %3, %54 : vector<32x32xf32>
    %56 = vector.extract_strided_slice %43 {offsets = [0, 4], sizes = [32, 1], strides = [1, 1]} : vector<32x6xf32> to vector<32x1xf32>
    %57 = vector.broadcast %56 : vector<32x1xf32> to vector<32x32xf32>
    %58 = arith.mulf %4, %57 : vector<32x32xf32>
    %59 = vector.extract_strided_slice %43 {offsets = [0, 5], sizes = [32, 1], strides = [1, 1]} : vector<32x6xf32> to vector<32x1xf32>
    %60 = vector.broadcast %59 : vector<32x1xf32> to vector<32x32xf32>
    %61 = arith.mulf %5, %60 : vector<32x32xf32>
    %62 = tpu.concatenate %46, %49, %52, %55, %58, %61 in 0 : vector<32x32xf32>, vector<32x32xf32>, vector<32x32xf32>, vector<32x32xf32>, vector<32x32xf32>, vector<32x32xf32> -> vector<192x32xf32>
    %c0_31 = arith.constant 0 : index
    %c0_32 = arith.constant 0 : index
    %63 = vector.load %arg9[%c0_31, %c0_32] : memref<32x32xf32, #tpu.memory_space<vmem>>, vector<32x32xf32>
    %cst_33 = arith.constant dense<0.000000e+00> : vector<192x32xf32>
    %64 = tpu.matmul %62, %63, %cst_33 {dimension_numbers = #tpu.dot_dimension_numbers<[1], [0], [0], [1], [0, 0, 1, 1], [], []>} : vector<192x32xf32>, vector<32x32xf32>, vector<192x32xf32> -> vector<192x32xf32>
    %65 = vector.extract_strided_slice %64 {offsets = [0, 0], sizes = [32, 32], strides = [1, 1]} : vector<192x32xf32> to vector<32x32xf32>
    %66 = vector.extract_strided_slice %64 {offsets = [32, 0], sizes = [32, 32], strides = [1, 1]} : vector<192x32xf32> to vector<32x32xf32>
    %67 = vector.extract_strided_slice %64 {offsets = [64, 0], sizes = [32, 32], strides = [1, 1]} : vector<192x32xf32> to vector<32x32xf32>
    %68 = vector.extract_strided_slice %64 {offsets = [96, 0], sizes = [32, 32], strides = [1, 1]} : vector<192x32xf32> to vector<32x32xf32>
    %69 = vector.extract_strided_slice %64 {offsets = [128, 0], sizes = [32, 32], strides = [1, 1]} : vector<192x32xf32> to vector<32x32xf32>
    %70 = arith.mulf %65, %49 : vector<32x32xf32>
    %cst_34 = arith.constant dense<0.000000e+00> : vector<32xf32>
    %71 = vector.multi_reduction <add>, %70, %cst_34 [1] : vector<32x32xf32> to vector<32xf32>
    %72 = vector.shape_cast %71 : vector<32xf32> to vector<32x1xf32>
    %73 = arith.mulf %65, %52 : vector<32x32xf32>
    %cst_35 = arith.constant dense<0.000000e+00> : vector<32xf32>
    %74 = vector.multi_reduction <add>, %73, %cst_35 [1] : vector<32x32xf32> to vector<32xf32>
    %75 = vector.shape_cast %74 : vector<32xf32> to vector<32x1xf32>
    %76 = arith.mulf %65, %55 : vector<32x32xf32>
    %cst_36 = arith.constant dense<0.000000e+00> : vector<32xf32>
    %77 = vector.multi_reduction <add>, %76, %cst_36 [1] : vector<32x32xf32> to vector<32xf32>
    %78 = vector.shape_cast %77 : vector<32xf32> to vector<32x1xf32>
    %79 = arith.mulf %65, %58 : vector<32x32xf32>
    %cst_37 = arith.constant dense<0.000000e+00> : vector<32xf32>
    %80 = vector.multi_reduction <add>, %79, %cst_37 [1] : vector<32x32xf32> to vector<32xf32>
    %81 = vector.shape_cast %80 : vector<32xf32> to vector<32x1xf32>
    %82 = arith.mulf %65, %61 : vector<32x32xf32>
    %cst_38 = arith.constant dense<0.000000e+00> : vector<32xf32>
    %83 = vector.multi_reduction <add>, %82, %cst_38 [1] : vector<32x32xf32> to vector<32xf32>
    %84 = vector.shape_cast %83 : vector<32xf32> to vector<32x1xf32>
    %85 = arith.mulf %66, %52 : vector<32x32xf32>
    %cst_39 = arith.constant dense<0.000000e+00> : vector<32xf32>
    %86 = vector.multi_reduction <add>, %85, %cst_39 [1] : vector<32x32xf32> to vector<32xf32>
    %87 = vector.shape_cast %86 : vector<32xf32> to vector<32x1xf32>
    %88 = arith.mulf %66, %55 : vector<32x32xf32>
    %cst_40 = arith.constant dense<0.000000e+00> : vector<32xf32>
    %89 = vector.multi_reduction <add>, %88, %cst_40 [1] : vector<32x32xf32> to vector<32xf32>
    %90 = vector.shape_cast %89 : vector<32xf32> to vector<32x1xf32>
    %91 = arith.mulf %66, %58 : vector<32x32xf32>
    %cst_41 = arith.constant dense<0.000000e+00> : vector<32xf32>
    %92 = vector.multi_reduction <add>, %91, %cst_41 [1] : vector<32x32xf32> to vector<32xf32>
    %93 = vector.shape_cast %92 : vector<32xf32> to vector<32x1xf32>
    %94 = arith.mulf %66, %61 : vector<32x32xf32>
    %cst_42 = arith.constant dense<0.000000e+00> : vector<32xf32>
    %95 = vector.multi_reduction <add>, %94, %cst_42 [1] : vector<32x32xf32> to vector<32xf32>
    %96 = vector.shape_cast %95 : vector<32xf32> to vector<32x1xf32>
    %97 = arith.mulf %67, %55 : vector<32x32xf32>
    %cst_43 = arith.constant dense<0.000000e+00> : vector<32xf32>
    %98 = vector.multi_reduction <add>, %97, %cst_43 [1] : vector<32x32xf32> to vector<32xf32>
    %99 = vector.shape_cast %98 : vector<32xf32> to vector<32x1xf32>
    %100 = arith.mulf %67, %58 : vector<32x32xf32>
    %cst_44 = arith.constant dense<0.000000e+00> : vector<32xf32>
    %101 = vector.multi_reduction <add>, %100, %cst_44 [1] : vector<32x32xf32> to vector<32xf32>
    %102 = vector.shape_cast %101 : vector<32xf32> to vector<32x1xf32>
    %103 = arith.mulf %67, %61 : vector<32x32xf32>
    %cst_45 = arith.constant dense<0.000000e+00> : vector<32xf32>
    %104 = vector.multi_reduction <add>, %103, %cst_45 [1] : vector<32x32xf32> to vector<32xf32>
    %105 = vector.shape_cast %104 : vector<32xf32> to vector<32x1xf32>
    %106 = arith.mulf %68, %58 : vector<32x32xf32>
    %cst_46 = arith.constant dense<0.000000e+00> : vector<32xf32>
    %107 = vector.multi_reduction <add>, %106, %cst_46 [1] : vector<32x32xf32> to vector<32xf32>
    %108 = vector.shape_cast %107 : vector<32xf32> to vector<32x1xf32>
    %109 = arith.mulf %68, %61 : vector<32x32xf32>
    %cst_47 = arith.constant dense<0.000000e+00> : vector<32xf32>
    %110 = vector.multi_reduction <add>, %109, %cst_47 [1] : vector<32x32xf32> to vector<32xf32>
    %111 = vector.shape_cast %110 : vector<32xf32> to vector<32x1xf32>
    %112 = arith.mulf %69, %61 : vector<32x32xf32>
    %cst_48 = arith.constant dense<0.000000e+00> : vector<32xf32>
    %113 = vector.multi_reduction <add>, %112, %cst_48 [1] : vector<32x32xf32> to vector<32xf32>
    %114 = vector.shape_cast %113 : vector<32xf32> to vector<32x1xf32>
    %115 = tpu.concatenate %72, %75, %78, %81, %84, %87, %90, %93, %96, %99, %102, %105, %108, %111, %114 in 1 : vector<32x1xf32>, vector<32x1xf32>, vector<32x1xf32>, vector<32x1xf32>, vector<32x1xf32>, vector<32x1xf32>, vector<32x1xf32>, vector<32x1xf32>, vector<32x1xf32>, vector<32x1xf32>, vector<32x1xf32>, vector<32x1xf32>, vector<32x1xf32>, vector<32x1xf32>, vector<32x1xf32> -> vector<32x15xf32>
    %c0_49 = arith.constant 0 : index
    %c0_50 = arith.constant 0 : index
    %116 = vector.load %arg10[%c0_49, %c0_50] : memref<32x15xf32, #tpu.memory_space<vmem>>, vector<32x15xf32>
    tpu.vector_store %arg10[%c0_49, %c0_50], %115 {strides = array<i32>} : memref<32x15xf32, #tpu.memory_space<vmem>>, vector<32x15xf32>,
    return
  }
  func.func @transform_0(%arg0: i32) -> (i32, i32) {
    %c0_i32 = arith.constant 0 : i32
    %c0_i32_0 = arith.constant 0 : i32
    return %arg0, %c0_i32 : i32, i32
  }
  func.func @transform_1(%arg0: i32) -> (i32, i32) {
    %c0_i32 = arith.constant 0 : i32
    %c0_i32_0 = arith.constant 0 : i32
    return %arg0, %c0_i32 : i32, i32
  }
  func.func @transform_2(%arg0: i32) -> (i32, i32) {
    %c0_i32 = arith.constant 0 : i32
    %c0_i32_0 = arith.constant 0 : i32
    return %arg0, %c0_i32 : i32, i32
  }
  func.func @transform_3(%arg0: i32) -> (i32, i32) {
    %c0_i32 = arith.constant 0 : i32
    %c0_i32_0 = arith.constant 0 : i32
    return %arg0, %c0_i32 : i32, i32
  }
  func.func @transform_4(%arg0: i32) -> (i32, i32) {
    %c0_i32 = arith.constant 0 : i32
    %c0_i32_0 = arith.constant 0 : i32
    return %arg0, %c0_i32 : i32, i32
  }
  func.func @transform_5(%arg0: i32) -> (i32, i32) {
    %c0_i32 = arith.constant 0 : i32
    %c0_i32_0 = arith.constant 0 : i32
    return %arg0, %c0_i32 : i32, i32
  }
  func.func @transform_6(%arg0: i32) -> (i32, i32) {
    %c0_i32 = arith.constant 0 : i32
    %c0_i32_0 = arith.constant 0 : i32
    %c0_i32_1 = arith.constant 0 : i32
    return %c0_i32, %c0_i32_0 : i32, i32
  }
  func.func @transform_7(%arg0: i32) -> (i32, i32) {
    %c0_i32 = arith.constant 0 : i32
    %c0_i32_0 = arith.constant 0 : i32
    %c0_i32_1 = arith.constant 0 : i32
    return %c0_i32, %c0_i32_0 : i32, i32
  }
  func.func @transform_8(%arg0: i32) -> (i32, i32) {
    %c0_i32 = arith.constant 0 : i32
    %c0_i32_0 = arith.constant 0 : i32
    %c0_i32_1 = arith.constant 0 : i32
    return %c0_i32, %c0_i32_0 : i32, i32
  }
  func.func @transform_9(%arg0: i32) -> (i32, i32) {
    %c0_i32 = arith.constant 0 : i32
    %c0_i32_0 = arith.constant 0 : i32
    return %arg0, %c0_i32 : i32, i32
  }
}

</mosaic_0001>

<bundles_post_ra>
// kernel: tpu_custom_call.1
= control target key start
LH: loop header
LB: loop body
LE: loop exit
PB: predicated region body
PF: predicated region fallthrough
CT: control target
= control target key end

     0   :  { %s1915_s30 = smov 0   ;;  %s2479_s0 = inlined_call_operand.vmem [shape: f32[128,32], index: 0, kind: input, shape index: {}]   ;;  %s2480_s1 = inlined_call_operand.vmem [shape: f32[128,32], index: 1, kind: input, shape index: {}]   ;;  %s2481_s2 = inlined_call_operand.vmem [shape: f32[128,32], index: 2, kind: input, shape index: {}]   ;;  %s2482_s3 = inlined_call_operand.vmem [shape: f32[128,32], index: 3, kind: input, shape index: {}]   ;;  %s2483_s4 = inlined_call_operand.vmem [shape: f32[128,32], index: 4, kind: input, shape index: {}]   ;;  %s2484_s5 = inlined_call_operand.vmem [shape: f32[128,32], index: 5, kind: input, shape index: {}]   ;;  %s2485_s6 = inlined_call_operand.vmem [shape: f32[6,3], index: 6, kind: input, shape index: {}]   ;;  %s2486_s7 = inlined_call_operand.vmem [shape: f32[3,6], index: 7, kind: input, shape index: {}]   ;;  %s2487_s8 = inlined_call_operand.vmem [shape: f32[32,32], index: 8, kind: input, shape index: {}]   ;;  %s2488_s9 = inlined_call_operand.vmem [shape: f32[128,15], index: 9, kind: output, shape index: {}]  }
   0x1 LB: > { %s1636_s10 = sadd.s32 4294967295, %s1857_s30   ;;  %p1640_p0 = scmp.ge.s32.totalorder %s1857_s30, 1  ;;  %s1857_s30 = sphi %s1915_s30, %s19_s30  }
   0x2   : > { %p343_p1 = scmp.lt.s32.totalorder %s1857_s30, 5 }
   0x4   : > { %p344_p2 = pnand %p1640_p0, %p343_p1 }
   0x5   : > { %s1641_s11 = sshll.u32 (!%p344_p2), %s1636_s10, 2 }
   0x6   : > { %347 = sbr.rel (%p344_p2) target bundleno = 1207 (0x4b7), region = 56  ;;  %p405_p3 = scmp.lt.s32.totalorder (!%p344_p2), %s1641_s11, 15 }
   0xb   : > { %s2490_s11 = smov (!%p405_p3, %s1641_s11), 15  ;;  %vm470_vm0 = vcmask 261120   ;;  %v593_v48 = vld [vmem:[%s2485_s6] sm:$0x3f]  ;;  %vm607_vm1 = vcmask 1045504   ;;  %vm568_vm2 = vcmask 7168  }
   0xc   : > { %s1923_s12 = sshll.u32 %s2490_s11, 3  ;;  %1733 = vmatprep.subr.msk.mxu0 %vm607_vm1, %v593_v48  ;;  %vm573_vm3 = vcmask 15360   ;;  %vm578_vm4 = vcmask 23552   ;;  %vm583_vm5 = vcmask 31744   ;;  %vm588_vm6 = vcmask 39936  }
   0xd   : > { %s1929_s15 = scalar_lea.vmem %s2479_s0, %s1923_s12  ;;  %s1935_s18 = scalar_lea.vmem %s2480_s1, %s1923_s12  ;;  %1734 = vmatpush3.msk.msra.mxu0 %vm607_vm1, %v593_v48  ;;  %vm594_vm7 = vcmask 48128   ;;  %vm713_vm8 = vcmask 1042432   ;;  %vm1475_vm9 = vcmask 56320   ;;  %vm1480_vm10 = vcmask 64512  }
   0xe   : > { %v1938_v0 = vld [vmem:[%s1929_s15 + $0x8] sm:$0xff]  ;;  %v1941_v1 = vld [vmem:[%s1929_s15] sm:$0xff]  ;;  %s1957_s21 = scalar_lea.vmem %s2481_s2, %s1923_s12  ;;  %s1973_s24 = scalar_lea.vmem %s2482_s3, %s1923_s12  ;;  %v1996_v16 = vld [vmem:[%s1929_s15 + $0x10] sm:$0xff]  ;;  %vm1485_vm11 = vcmask 72704   ;;  %vm1490_vm12 = vcmask 80896   ;;  %vm1495_vm13 = vcmask 89088  }
   0xf   : > { %v1944_v2 = vld [vmem:[%s1935_s18 + $0x8] sm:$0xff]  ;;  %v474_v3 = vsel %vm470_vm0, %v1938_v0, 0.0  ;;  %v471_v4 = vsel %vm470_vm0, %v1941_v1, 0.0  ;;  %v1951_v5 = vld [vmem:[%s1935_s18] sm:$0xff]  ;;  %s1989_s27 = scalar_lea.vmem %s2483_s4, %s1923_s12  ;;  %v477_v18 = vsel %vm470_vm0, %v1996_v16, 0.0  ;;  %v2009_v21 = vld [vmem:[%s1935_s18 + $0x10] sm:$0xff]  ;;  %s2015_s10 = scalar_lea.vmem %s2484_s5, %s1923_s12 }
  0x10   : > { %475 = vadd.xlane.f32.xlu1 %v474_v3  ;;  %472 = vadd.xlane.f32.xlu0 %v471_v4  ;;  %v491_v6 = vsel %vm470_vm0, %v1944_v2, 0.0  ;;  %v488_v7 = vsel %vm470_vm0, %v1951_v5, 0.0  ;;  %v1964_v8 = vld [vmem:[%s1957_s21 + $0x8] sm:$0xff]  ;;  %v1967_v9 = vld [vmem:[%s1957_s21] sm:$0xff]  ;;  %v494_v23 = vsel %vm470_vm0, %v2009_v21, 0.0  ;;  %v2022_v24 = vld [vmem:[%s1929_s15 + $0x18] sm:$0xff]  ;;  %s2428_s26 = scalar_lea.vmem %s2488_s9, %s1923_s12 }
  0x11   : > { %v507_v10 = vsel %vm470_vm0, %v1964_v8, 0.0  ;;  %v504_v11 = vsel %vm470_vm0, %v1967_v9, 0.0  ;;  %v1980_v12 = vld [vmem:[%s1973_s24 + $0x8] sm:$0xff]  ;;  %v1983_v13 = vld [vmem:[%s1973_s24] sm:$0xff]  ;;  %v480_v26 = vsel %vm470_vm0, %v2022_v24, 0.0  ;;  %v2032_v28 = vld [vmem:[%s1957_s21 + $0x10] sm:$0xff] }
  0x12   : > { %v523_v14 = vsel %vm470_vm0, %v1980_v12, 0.0  ;;  %v520_v15 = vsel %vm470_vm0, %v1983_v13, 0.0  ;;  %v1999_v17 = vld [vmem:[%s1989_s27] sm:$0xff]  ;;  %v2006_v20 = vld [vmem:[%s1989_s27 + $0x8] sm:$0xff]  ;;  %v2035_v29 = vld [vmem:[%s1935_s18 + $0x18] sm:$0xff]  ;;  %v510_v30 = vsel %vm470_vm0, %v2032_v28, 0.0 }
  0x13   : > { %v536_v19 = vsel %vm470_vm0, %v1999_v17, 0.0  ;;  %v539_v22 = vsel %vm470_vm0, %v2006_v20, 0.0  ;;  %v2025_v25 = vld [vmem:[%s2015_s10] sm:$0xff]  ;;  %v497_v31 = vsel %vm470_vm0, %v2035_v29, 0.0  ;;  %v2042_v32 = vld [vmem:[%s1957_s21 + $0x18] sm:$0xff]  ;;  %v2045_v33 = vld [vmem:[%s2015_s10 + $0x8] sm:$0xff] }
  0x14   : > { %492 = vadd.xlane.f32.xlu1 %v491_v6  ;;  %489 = vadd.xlane.f32.xlu0 %v488_v7  ;;  %v552_v27 = vsel %vm470_vm0, %v2025_v25, 0.0  ;;  %v513_v34 = vsel %vm470_vm0, %v2042_v32, 0.0  ;;  %v555_v35 = vsel %vm470_vm0, %v2045_v33, 0.0  ;;  %v2052_v36 = vld [vmem:[%s1973_s24 + $0x18] sm:$0xff]  ;;  %v2055_v37 = vld [vmem:[%s1973_s24 + $0x10] sm:$0xff]  ;;  %vm1500_vm14 = vcmask 97280  }
  0x15   : > { %v529_v38 = vsel %vm470_vm0, %v2052_v36, 0.0  ;;  %v526_v39 = vsel %vm470_vm0, %v2055_v37, 0.0  ;;  %v2062_v40 = vld [vmem:[%s1989_s27 + $0x18] sm:$0xff]  ;;  %v2065_v41 = vld [vmem:[%s1989_s27 + $0x10] sm:$0xff]  ;;  %vm1505_vm15 = vcmask 105472   ;;  %vm1515_vm1 = vcmask 121856  }
  0x16   : > { %v545_v42 = vsel %vm470_vm0, %v2062_v40, 0.0  ;;  %v542_v43 = vsel %vm470_vm0, %v2065_v41, 0.0  ;;  %v2072_v44 = vld [vmem:[%s2015_s10 + $0x18] sm:$0xff]  ;;  %v2075_v45 = vld [vmem:[%s2015_s10 + $0x10] sm:$0xff] }
  0x17   : > { %v561_v46 = vsel %vm470_vm0, %v2072_v44, 0.0  ;;  %v558_v47 = vsel %vm470_vm0, %v2075_v45, 0.0 }
  0x18   : > { %508 = vadd.xlane.f32.xlu1 %v507_v10  ;;  %505 = vadd.xlane.f32.xlu0 %v504_v11 }
  0x1c   : > { %524 = vadd.xlane.f32.xlu1 %v523_v14  ;;  %521 = vadd.xlane.f32.xlu0 %v520_v15 }
  0x20   : > { %478 = vadd.xlane.f32.xlu1 %v477_v18  ;;  %537 = vadd.xlane.f32.xlu0 %v536_v19 }
  0x24   : > { %540 = vadd.xlane.f32.xlu1 %v539_v22  ;;  %495 = vadd.xlane.f32.xlu0 %v494_v23 }
  0x28   : > { %481 = vadd.xlane.f32.xlu1 %v480_v26  ;;  %553 = vadd.xlane.f32.xlu0 %v552_v27 }
  0x2c   : > { %511 = vadd.xlane.f32.xlu1 %v510_v30  ;;  %498 = vadd.xlane.f32.xlu0 %v497_v31 }
  0x30   : > { %514 = vadd.xlane.f32.xlu1 %v513_v34  ;;  %556 = vadd.xlane.f32.xlu0 %v555_v35 }
  0x34   : > { %530 = vadd.xlane.f32.xlu1 %v529_v38  ;;  %527 = vadd.xlane.f32.xlu0 %v526_v39 }
  0x38   : > { %546 = vadd.xlane.f32.xlu1 %v545_v42  ;;  %543 = vadd.xlane.f32.xlu0 %v542_v43 }
  0x3c   : > { %562 = vadd.xlane.f32.xlu1 %v561_v46  ;;  %559 = vadd.xlane.f32.xlu0 %v558_v47 }
  0x99   : > { %v476_v49 = vpop.xlane.xlu1 %475  ;;  %v473_v50 = vpop.xlane.xlu0 %472 }
  0x9a   : > { %v484_v63 = vmul.f32 0.03125, %v473_v50  ;;  %v485_v6 = vmul.f32 0.03125, %v476_v49 }
  0x9d   : > { %v493_v51 = vpop.xlane.xlu1 %492  ;;  %v490_v52 = vpop.xlane.xlu0 %489 }
  0x9e   : > { %v500_v59 = vmul.f32 0.03125, %v490_v52  ;;  %v501_v7 = vmul.f32 0.03125, %v493_v51 }
  0xa0   : > { %v569_v10 = vsel %vm568_vm2, %v484_v63, %v500_v59  ;;  %v570_v26 = vsel %vm568_vm2, %v485_v6, %v501_v7 }
  0xa1   : > { %v509_v53 = vpop.xlane.xlu1 %508  ;;  %v506_v54 = vpop.xlane.xlu0 %505 }
  0xa2   : > { %v516_v60 = vmul.f32 0.03125, %v506_v54  ;;  %v517_v22 = vmul.f32 0.03125, %v509_v53 }
  0xa4   : > { %v574_v11 = vsel %vm573_vm3, %v569_v10, %v516_v60  ;;  %v575_v35 = vsel %vm573_vm3, %v570_v26, %v517_v22 }
  0xa5   : > { %v525_v55 = vpop.xlane.xlu1 %524  ;;  %v522_v56 = vpop.xlane.xlu0 %521 }
  0xa6   : > { %v532_v3 = vmul.f32 0.03125, %v522_v56  ;;  %v533_v34 = vmul.f32 0.03125, %v525_v55 }
  0xa8   : > { %v579_v19 = vsel %vm578_vm4, %v574_v11, %v532_v3  ;;  %v580_v43 = vsel %vm578_vm4, %v575_v35, %v533_v34 }
  0xa9   : > { %v479_v57 = vpop.xlane.xlu1 %478  ;;  %v538_v58 = vpop.xlane.xlu0 %537 }
  0xaa   : > { %v548_v4 = vmul.f32 0.03125, %v538_v58  ;;  %v486_v51 = vmul.f32 0.03125, %v479_v57 }
  0xac   : > { %v584_v23 = vsel %vm583_vm5, %v579_v19, %v548_v4 }
  0xad   : > { %v541_v61 = vpop.xlane.xlu1 %540  ;;  %v496_v62 = vpop.xlane.xlu0 %495 }
  0xae   : > { %v549_v38 = vmul.f32 0.03125, %v541_v61  ;;  %v502_v52 = vmul.f32 0.03125, %v496_v62 }
  0xb0   : > { %v585_v47 = vsel %vm583_vm5, %v580_v43, %v549_v38  ;;  %v571_v4 = vsel %vm568_vm2, %v486_v51, %v502_v52 }
  0xb1   : > { %v482_v14 = vpop.xlane.xlu1 %481  ;;  %v554_v15 = vpop.xlane.xlu0 %553 }
  0xb2   : > { %v564_v18 = vmul.f32 0.03125, %v554_v15  ;;  %v487_v53 = vmul.f32 0.03125, %v482_v14 }
  0xb4   : > { %v589_v27 = vsel %vm588_vm6, %v584_v23, %v564_v18 }
  0xb5   : > { %v512_v30 = vpop.xlane.xlu1 %511  ;;  %1735 = vmatprep.mubr.msk.f32.mxu0 %vm594_vm7, %v589_v27  ;;  %v499_v31 = vpop.xlane.xlu0 %498  ;;  %v700_v27 = vld [vmem:[%s2486_s7] sm:$0x7] }
  0xb6   : > { %v503_v54 = vmul.f32 0.03125, %v499_v31  ;;  %v518_v55 = vmul.f32 0.03125, %v512_v30  ;;  %1741 = vmatprep.subr.msk.mxu1 %vm713_vm8, %v700_v27 }
  0xb7   : > { %1742 = vmatpush3.msk.msra.mxu1 %vm713_vm8, %v700_v27 }
  0xb8   : > { %v572_v6 = vsel %vm568_vm2, %v487_v53, %v503_v54  ;;  %v576_v7 = vsel %vm573_vm3, %v571_v4, %v518_v55 }
  0xb9   : > { %v515_v39 = vpop.xlane.xlu1 %514  ;;  %v557_v42 = vpop.xlane.xlu0 %556 }
  0xba   : > { %v565_v46 = vmul.f32 0.03125, %v557_v42  ;;  %v519_v56 = vmul.f32 0.03125, %v515_v39 }
  0xbc   : > { %v590_v48 = vsel %vm588_vm6, %v585_v47, %v565_v46  ;;  %v577_v10 = vsel %vm573_vm3, %v572_v6, %v519_v56  ;;  %v1859_v46 = vmov 3   ;;  %v1860_v47 = vmov 0  }
  0xbd   : > { %v531_v49 = vpop.xlane.xlu1 %530  ;;  %1736 = vmatmul.mubr.msk.f32.vlgmr.msra.gmra.mxu0 %vm594_vm7, %v590_v48  ;;  %v528_v50 = vpop.xlane.xlu0 %527  ;;  %1817 = vset.pattern.permute.xlu0 %v1859_v46 }
  0xbe   : > { %v535_v60 = vmul.f32 0.03125, %v531_v49  ;;  %v534_v61 = vmul.f32 0.03125, %v528_v50  ;;  %1815 = vset.pattern.permute.xlu1 %v1860_v47 }
  0xc0   : > { %v582_v11 = vsel %vm578_vm4, %v577_v10, %v535_v60  ;;  %v581_v14 = vsel %vm578_vm4, %v576_v7, %v534_v61  ;;  %v957_v61 = vld [vmem:[%s2487_s8 + $0x18] sm:$0xff]  ;;  %v955_v10 = vld [vmem:[%s2487_s8 + $0x8] sm:$0xff] }
  0xc1   : > { %v547_v58 = vpop.xlane.xlu1 %546  ;;  %v544_v59 = vpop.xlane.xlu0 %543  ;;  %1749 = vmatprep.subr.mxu0 %v957_v61  ;;  %1793 = vmatprep.subr.mxu1 %v957_v61 }
  0xc2   : > { %v551_v63 = vmul.f32 0.03125, %v547_v58  ;;  %v550_v3 = vmul.f32 0.03125, %v544_v59  ;;  %1750 = vmatpush3.msra.mxu0 %v957_v61 }
  0xc4   : > { %v587_v19 = vsel %vm583_vm5, %v582_v11, %v551_v63  ;;  %v586_v22 = vsel %vm583_vm5, %v581_v14, %v550_v3  ;;  %v956_v3 = vld [vmem:[%s2487_s8 + $0x10] sm:$0xff]  ;;  %v1861_v14 = vmov 1  }
  0xc5   : > { %v563_v57 = vpop.xlane.xlu1 %562  ;;  %v560_v62 = vpop.xlane.xlu0 %559  ;;  %1751 = vmatprep.subr.mxu0 %v956_v3 }
  0xc6   : > { %v567_v15 = vmul.f32 0.03125, %v563_v57  ;;  %v566_v18 = vmul.f32 0.03125, %v560_v62  ;;  %1752 = vmatpush3.msra.mxu0 %v956_v3  ;;  %v954_v62 = vld [vmem:[%s2487_s8] sm:$0xff] }
  0xc7   : > { %1753 = vmatprep.subr.mxu0 %v955_v10 }
  0xc8   : > { %v591_v23 = vsel %vm588_vm6, %v586_v22, %v566_v18  ;;  %v592_v26 = vsel %vm588_vm6, %v587_v19, %v567_v15  ;;  %1754 = vmatpush3.msra.mxu0 %v955_v10  ;;  %v1862_v19 = vmov 2  }
  0xc9   : > { %1738 = vmatprep.mubr.msk.f32.mxu0 %vm594_vm7, %v591_v23  ;;  %1755 = vmatprep.subr.mxu0 %v954_v62 }
  0xca   : > { %1739 = vmatmul.mubr.msk.f32.gmra.mxu0 %vm594_vm7, %v592_v26  ;;  %v1863_v26 = vmov 4  }
  0xcb   : > { %1756 = vmatpush3.msra.mxu0 %v954_v62 }
 0x17d   : > { %v1737_v30 = vpop.f32.mrf.mxu0 }
 0x17e   : > { %v697_v35 = vmax.f32 %v1737_v30, 0.0 }
 0x17f   : > { %v677_v31 = vpop.f32.mrf.mxu0 }
 0x180   : > { %v696_v34 = vmax.f32 %v677_v31, 0.0  ;;  %v1864_v31 = vmov 5  }
 0x182   : > { %1743 = vmatprep.mubr.msk.f32.mxu1 %vm578_vm4, %v696_v34 }
 0x183   : > { %1744 = vmatmul.mubr.msk.f32.vlgmr.msra.gmra.mxu1 %vm578_vm4, %v697_v35 }
 0x184   : > { %1797 = vmatpush3.msra.mxu1 %v957_v61 }
 0x185   : > { %1794 = vmatprep.subr.mxu1 %v956_v3 }
 0x186   : > { %1798 = vmatpush3.msra.mxu1 %v956_v3 }
 0x187   : > { %1795 = vmatprep.subr.mxu1 %v955_v10 }
 0x188   : > { %1799 = vmatpush3.msra.mxu1 %v955_v10 }
 0x189   : > { %1796 = vmatprep.subr.mxu1 %v954_v62 }
 0x18a   : > { %v1740_v38 = vpop.f32.mrf.mxu0  ;;  %1800 = vmatpush3.msra.mxu1 %v954_v62 }
 0x18b   : > { %v699_v43 = vmax.f32 %v1740_v38, 0.0 }
 0x18c   : > { %v687_v39 = vpop.f32.mrf.mxu0 }
 0x18d   : > { %v698_v42 = vmax.f32 %v687_v39, 0.0 }
 0x18f   : > { %1746 = vmatprep.mubr.msk.f32.mxu1 %vm578_vm4, %v698_v42 }
 0x190   : > { %1747 = vmatmul.mubr.msk.f32.gmra.mxu1 %vm578_vm4, %v699_v43 }
 0x243   : > { %v1745_v48 = vpop.f32.mrf.mxu1 }
 0x244   : > { %v1666_v49 = vmul.f32 -1.442695, %v1745_v48 }
 0x245   : > { %v783_v50 = vpop.f32.mrf.mxu1 }
 0x246   : > { %1835 = vpow2.f32 %v1666_v49  ;;  %v1665_v51 = vmul.f32 -1.442695, %v783_v50 }
 0x248   : > { %1837 = vpow2.f32 %v1665_v51 }
 0x250   : > { %v1748_v52 = vpop.f32.mrf.mxu1 }
 0x251   : > { %v1668_v60 = vmul.f32 -1.442695, %v1748_v52 }
 0x252   : > { %v793_v53 = vpop.f32.mrf.mxu1 }
 0x253   : > { %v1836_v54 = vpop.eup %1835  ;;  %v1667_v55 = vmul.f32 -1.442695, %v793_v53 }
 0x254   : > { %v815_v56 = vadd.f32 1.0, %v1836_v54 }
 0x255   : > { %v1838_v58 = vpop.eup %1837  ;;  %1839 = vpow2.f32 %v1667_v55 }
 0x256   : > { %1841 = vrcp.f32 %v815_v56  ;;  %v814_v59 = vadd.f32 1.0, %v1838_v58 }
 0x258   : > { %1843 = vrcp.f32 %v814_v59 }
 0x259   : > { %1845 = vpow2.f32 %v1668_v60 }
 0x262   : > { %v1840_v63 = vpop.eup %1839 }
 0x263   : > { %v1842_v4 = vpop.eup %1841  ;;  %v816_v6 = vadd.f32 1.0, %v1840_v63 }
 0x264   : > { %v2123_v7 = vmul.f32 2.0, %v1842_v4 }
 0x265   : > { %1847 = vrcp.f32 %v816_v6  ;;  %v1844_v57 = vpop.eup %1843 }
 0x266   : > { %899 = vperm.xlu0 %1817, %v2123_v7   ;;  %837 = vperm.xlu1 %1815, %v2123_v7   ;;  %v826_v11 = vmul.f32 2.0, %v1844_v57  ;;  %v1846_v15 = vpop.eup %1845 }
 0x267   : > { %v817_v18 = vadd.f32 1.0, %v1846_v15 }
 0x269   : > { %1849 = vrcp.f32 %v817_v18 }
 0x26a   : > { %1819 = vset.pattern.permute.xlu0 %v1860_v47  ;;  %1816 = vset.pattern.permute.xlu1 %v1861_v14 }
 0x26b   : > { %859 = vperm.xlu1 %1816, %v2123_v7   ;;  %832 = vperm.xlu0 %1819, %v826_v11  }
 0x26f   : > { %1818 = vset.pattern.permute.xlu1 %v1862_v19  ;;  %1830 = vset.pattern.permute.xlu0 %v1859_v46 }
 0x270   : > { %879 = vperm.xlu1 %1818, %v2123_v7  }
 0x272   : > { %v1848_v22 = vpop.eup %1847 }
 0x273   : > { %v828_v23 = vmul.f32 2.0, %v1848_v22 }
 0x274   : > { %1820 = vset.pattern.permute.xlu1 %v1861_v14 }
 0x275   : > { %855 = vperm.xlu1 %1820, %v826_v11   ;;  %903 = vperm.xlu0 %1830, %v828_v23  }
 0x276   : > { %v1850_v27 = vpop.eup %1849 }
 0x277   : > { %v829_v30 = vmul.f32 2.0, %v1850_v27 }
 0x279   : > { %1821 = vset.pattern.permute.xlu1 %v1859_v46  ;;  %1831 = vset.pattern.permute.xlu0 %v1862_v19 }
 0x27a   : > { %895 = vperm.xlu1 %1821, %v826_v11   ;;  %883 = vperm.xlu0 %1831, %v828_v23  }
 0x27e   : > { %1822 = vset.pattern.permute.xlu1 %v1862_v19  ;;  %1832 = vset.pattern.permute.xlu0 %v1863_v26 }
 0x27f   : > { %875 = vperm.xlu1 %1822, %v826_v11   ;;  %919 = vperm.xlu0 %1832, %v2123_v7  }
 0x283   : > { %1823 = vset.pattern.permute.xlu1 %v1860_v47  ;;  %1833 = vset.pattern.permute.xlu0 %v1864_v31 }
 0x284   : > { %847 = vperm.xlu1 %1823, %v829_v30   ;;  %935 = vperm.xlu0 %1833, %v826_v11  }
 0x288   : > { %1824 = vset.pattern.permute.xlu1 %v1861_v14  ;;  %947 = vperm.xlu0 %1833, %v829_v30  }
 0x289   : > { %867 = vperm.xlu1 %1824, %v829_v30  }
 0x28d   : > { %1825 = vset.pattern.permute.xlu1 %v1860_v47 }
 0x28e   : > { %842 = vperm.xlu1 %1825, %v828_v23  }
 0x292   : > { %1826 = vset.pattern.permute.xlu1 %v1859_v46 }
 0x293   : > { %907 = vperm.xlu1 %1826, %v829_v30  }
 0x297   : > { %1827 = vset.pattern.permute.xlu1 %v1861_v14 }
 0x298   : > { %863 = vperm.xlu1 %1827, %v828_v23  }
 0x29c   : > { %1828 = vset.pattern.permute.xlu1 %v1862_v19 }
 0x29d   : > { %887 = vperm.xlu1 %1828, %v829_v30  }
 0x2a1   : > { %1829 = vset.pattern.permute.xlu1 %v1863_v26 }
 0x2a2   : > { %915 = vperm.xlu1 %1829, %v826_v11  }
 0x2a6   : > { %923 = vperm.xlu1 %1829, %v828_v23  }
 0x2aa   : > { %927 = vperm.xlu1 %1829, %v829_v30  }
 0x2ae   : > { %1834 = vset.pattern.permute.xlu1 %v1864_v31 }
 0x2af   : > { %939 = vperm.xlu1 %1834, %v2123_v7  }
 0x2b3   : > { %943 = vperm.xlu1 %1834, %v828_v23  }
 0x2e1   : > { %v838_v34 = vpop.permute.xlu1 %837  ;;  %v900_v35 = vpop.permute.xlu0 %899 }
 0x2e2   : > { %v851_v43 = vmul.f32 %v838_v34, %v1938_v0  ;;  %v2151_v51 = vmul.f32 %v900_v35, %v1980_v12 }
 0x2e6   : > { %v860_v38 = vpop.permute.xlu1 %859  ;;  %v833_v39 = vpop.permute.xlu0 %832 }
 0x2e7   : > { %v850_v42 = vmul.f32 %v833_v39, %v1941_v1  ;;  %v871_v56 = vmul.f32 %v860_v38, %v1944_v2 }
 0x2e9   : > { %1757 = vmatprep.mubr.msk.f32.mxu0 %vm470_vm0, %v850_v42 }
 0x2ea   : > { %1758 = vmatmul.mubr.msk.f32.vlgmr.msra.gmra.mxu0 %vm470_vm0, %v851_v43 }
 0x2eb   : > { %v880_v46 = vpop.permute.xlu1 %879 }
 0x2f0   : > { %v856_v47 = vpop.permute.xlu1 %855  ;;  %v904_v48 = vpop.permute.xlu0 %903 }
 0x2f1   : > { %v2154_v52 = vmul.f32 %v904_v48, %v2055_v37  ;;  %v2165_v37 = vmul.f32 %v856_v47, %v1951_v5 }
 0x2f5   : > { %v896_v49 = vpop.permute.xlu1 %895  ;;  %v884_v59 = vpop.permute.xlu0 %883 }
 0x2f6   : > { %v2148_v50 = vmul.f32 %v896_v49, %v1983_v13 }
 0x2f8   : > { %1775 = vmatprep.mubr.msk.f32.mxu1 %vm470_vm0, %v2148_v50 }
 0x2f9   : > { %1776 = vmatmul.mubr.msk.f32.vlgmr.msra.gmra.mxu1 %vm470_vm0, %v2151_v51 }
 0x2fa   : > { %v876_v0 = vpop.permute.xlu1 %875  ;;  %1778 = vmatprep.mubr.msk.f32.mxu1 %vm470_vm0, %v2154_v52 }
 0x2fb   : > { %v2185_v60 = vmul.f32 %v876_v0, %v1967_v9  ;;  %v920_v9 = vpop.permute.xlu0 %919 }
 0x2ff   : > { %v848_v1 = vpop.permute.xlu1 %847  ;;  %v936_v3 = vpop.permute.xlu0 %935 }
 0x300   : > { %v853_v12 = vmul.f32 %v848_v1, %v2022_v24  ;;  %v2227_v4 = vmul.f32 %v936_v3, %v2025_v25 }
 0x303   : > { %v948_v7 = vpop.permute.xlu0 %947 }
 0x304   : > { %v868_v53 = vpop.permute.xlu1 %867  ;;  %v2242_v25 = vmul.f32 %v948_v7, %v2072_v44 }
 0x305   : > { %v2182_v24 = vmul.f32 %v868_v53, %v2035_v29  ;;  %v2197_v29 = vmul.f32 %v884_v59, %v2032_v28 }
 0x309   : > { %v843_v13 = vpop.permute.xlu1 %842 }
 0x30a   : > { %v852_v54 = vmul.f32 %v843_v13, %v1996_v16 }
 0x30c   : > { %1760 = vmatprep.mubr.msk.f32.mxu0 %vm470_vm0, %v852_v54 }
 0x30d   : > { %1761 = vmatmul.mubr.msk.f32.gmra.mxu0 %vm470_vm0, %v853_v12 }
 0x30e   : > { %v908_v55 = vpop.permute.xlu1 %907  ;;  %1763 = vmatprep.mubr.msk.f32.mxu0 %vm470_vm0, %v2165_v37 }
 0x30f   : > { %v2173_v58 = vmul.f32 %v908_v55, %v2052_v36 }
 0x311   : > { %1764 = vmatmul.mubr.msk.f32.gmra.mxu0 %vm470_vm0, %v871_v56  ;;  %1779 = vmatmul.mubr.msk.f32.gmra.mxu1 %vm470_vm0, %v2173_v58 }
 0x313   : > { %v864_v5 = vpop.permute.xlu1 %863 }
 0x314   : > { %v2179_v16 = vmul.f32 %v864_v5, %v2009_v21  ;;  %v2194_v21 = vmul.f32 %v880_v46, %v1964_v8  ;;  %v2210_v8 = vmul.f32 %v920_v9, %v2006_v20 }
 0x316   : > { %1766 = vmatprep.mubr.msk.f32.mxu0 %vm470_vm0, %v2179_v16 }
 0x317   : > { %1767 = vmatmul.mubr.msk.f32.gmra.mxu0 %vm470_vm0, %v2182_v24 }
 0x318   : > { %v888_v2 = vpop.permute.xlu1 %887  ;;  %1769 = vmatprep.mubr.msk.f32.mxu0 %vm470_vm0, %v2185_v60 }
 0x319   : > { %v2204_v36 = vmul.f32 %v888_v2, %v2042_v32 }
 0x31b   : > { %1770 = vmatmul.mubr.msk.f32.gmra.mxu0 %vm470_vm0, %v2194_v21 }
 0x31c   : > { %1772 = vmatprep.mubr.msk.f32.mxu0 %vm470_vm0, %v2197_v29 }
 0x31d   : > { %v916_v61 = vpop.permute.xlu1 %915 }
 0x31e   : > { %v2207_v63 = vmul.f32 %v916_v61, %v1999_v17 }
 0x31f   : > { %1773 = vmatmul.mubr.msk.f32.gmra.mxu0 %vm470_vm0, %v2204_v36 }
 0x320   : > { %1781 = vmatprep.mubr.msk.f32.mxu1 %vm470_vm0, %v2207_v63 }
 0x321   : > { %v924_v28 = vpop.permute.xlu1 %923  ;;  %1782 = vmatmul.mubr.msk.f32.gmra.mxu1 %vm470_vm0, %v2210_v8 }
 0x322   : > { %v2219_v32 = vmul.f32 %v924_v28, %v2065_v41 }
 0x324   : > { %1784 = vmatprep.mubr.msk.f32.mxu1 %vm470_vm0, %v2219_v32 }
 0x325   : > { %v928_v17 = vpop.permute.xlu1 %927 }
 0x326   : > { %v2224_v20 = vmul.f32 %v928_v17, %v2062_v40 }
 0x328   : > { %1785 = vmatmul.mubr.msk.f32.gmra.mxu1 %vm470_vm0, %v2224_v20 }
 0x329   : > { %1787 = vmatprep.mubr.msk.f32.mxu1 %vm470_vm0, %v2227_v4 }
 0x32a   : > { %v940_v6 = vpop.permute.xlu1 %939 }
 0x32b   : > { %v2234_v41 = vmul.f32 %v940_v6, %v2045_v33 }
 0x32d   : > { %1788 = vmatmul.mubr.msk.f32.gmra.mxu1 %vm470_vm0, %v2234_v41 }
 0x32e   : > { %v944_v10 = vpop.permute.xlu1 %943 }
 0x32f   : > { %v2239_v40 = vmul.f32 %v944_v10, %v2075_v45 }
 0x331   : > { %1790 = vmatprep.mubr.msk.f32.mxu1 %vm470_vm0, %v2239_v40 }
 0x332   : > { %1791 = vmatmul.mubr.msk.f32.gmra.mxu1 %vm470_vm0, %v2242_v25 }
 0x3aa   : > { %v1759_v57 = vpop.f32.mrf.mxu0 }
 0x3ab   : > { %v1228_v33 = vmul.f32 %v1759_v57, %v2194_v21  ;;  %v1212_v62 = vmul.f32 %v1759_v57, %v871_v56  ;;  %v1244_v45 = vmul.f32 %v1759_v57, %v2151_v51  ;;  %v1260_v23 = vmul.f32 %v1759_v57, %v2210_v8 }
 0x3ac   : > { %v1096_v11 = vpop.f32.mrf.mxu0  ;;  %v1276_v31 = vmul.f32 %v1759_v57, %v2234_v41 }
 0x3ad   : > { %v1234_v14 = vsel %vm470_vm0, %v1228_v33, 0.0  ;;  %v1218_v15 = vsel %vm470_vm0, %v1212_v62, 0.0  ;;  %v1227_v44 = vmul.f32 %v1096_v11, %v2185_v60  ;;  %v1250_v18 = vsel %vm470_vm0, %v1244_v45, 0.0 }
 0x3ae   : > { %1235 = vadd.xlane.f32.xlu1 %v1234_v14  ;;  %1219 = vadd.xlane.f32.xlu0 %v1218_v15  ;;  %v1243_v22 = vmul.f32 %v1096_v11, %v2148_v50  ;;  %v1266_v27 = vsel %vm470_vm0, %v1260_v23, 0.0  ;;  %v1259_v30 = vmul.f32 %v1096_v11, %v2207_v63  ;;  %v1282_v38 = vsel %vm470_vm0, %v1276_v31, 0.0 }
 0x3af   : > { %v1231_v19 = vsel %vm470_vm0, %v1227_v44, 0.0  ;;  %v1275_v39 = vmul.f32 %v1096_v11, %v2227_v4  ;;  %v1211_v13 = vmul.f32 %v1096_v11, %v2165_v37 }
 0x3b0   : > { %v1247_v26 = vsel %vm470_vm0, %v1243_v22, 0.0  ;;  %v1263_v35 = vsel %vm470_vm0, %v1259_v30, 0.0 }
 0x3b1   : > { %v1279_v49 = vsel %vm470_vm0, %v1275_v39, 0.0  ;;  %v1215_v54 = vsel %vm470_vm0, %v1211_v13, 0.0 }
 0x3b2   : > { %1251 = vadd.xlane.f32.xlu1 %v1250_v18  ;;  %1232 = vadd.xlane.f32.xlu0 %v1231_v19 }
 0x3b6   : > { %1248 = vadd.xlane.f32.xlu0 %v1247_v26  ;;  %1267 = vadd.xlane.f32.xlu1 %v1266_v27 }
 0x3b9   : > { %v1777_v34 = vpop.f32.mrf.mxu1 }
 0x3ba   : > { %v1404_v42 = vmul.f32 %v1777_v34, %v2210_v8  ;;  %1264 = vadd.xlane.f32.xlu0 %v1263_v35  ;;  %1283 = vadd.xlane.f32.xlu1 %v1282_v38  ;;  %v1420_v47 = vmul.f32 %v1777_v34, %v2234_v41 }
 0x3bb   : > { %v1156_v43 = vpop.f32.mrf.mxu1 }
 0x3bc   : > { %v1410_v46 = vsel %vm470_vm0, %v1404_v42, 0.0  ;;  %v1403_v48 = vmul.f32 %v1156_v43, %v2207_v63  ;;  %v1419_v0 = vmul.f32 %v1156_v43, %v2227_v4  ;;  %v1426_v1 = vsel %vm470_vm0, %v1420_v47, 0.0 }
 0x3be   : > { %1411 = vadd.xlane.f32.xlu1 %v1410_v46  ;;  %1280 = vadd.xlane.f32.xlu0 %v1279_v49  ;;  %v1407_v53 = vsel %vm470_vm0, %v1403_v48, 0.0  ;;  %v1423_v12 = vsel %vm470_vm0, %v1419_v0, 0.0 }
 0x3c2   : > { %1427 = vadd.xlane.f32.xlu1 %v1426_v1  ;;  %1408 = vadd.xlane.f32.xlu0 %v1407_v53 }
 0x3c6   : > { %1216 = vadd.xlane.f32.xlu1 %v1215_v54  ;;  %1424 = vadd.xlane.f32.xlu0 %v1423_v12 }
 0x3cd   : > { %v1762_v55 = vpop.f32.mrf.mxu0 }
 0x3ce   : > { %v1214_v56 = vmul.f32 %v1762_v55, %v2182_v24  ;;  %v1230_v9 = vmul.f32 %v1762_v55, %v2204_v36  ;;  %v1246_v3 = vmul.f32 %v1762_v55, %v2173_v58  ;;  %v1262_v6 = vmul.f32 %v1762_v55, %v2224_v20 }
 0x3cf   : > { %v1106_v5 = vpop.f32.mrf.mxu0  ;;  %v1278_v62 = vmul.f32 %v1762_v55, %v2242_v25 }
 0x3d0   : > { %v1224_v59 = vsel %vm470_vm0, %v1214_v56, 0.0  ;;  %v1213_v2 = vmul.f32 %v1106_v5, %v2179_v16  ;;  %v1229_v61 = vmul.f32 %v1106_v5, %v2197_v29  ;;  %v1240_v28 = vsel %vm470_vm0, %v1230_v9, 0.0 }
 0x3d1   : > { %1225 = vadd.xlane.f32.xlu1 %v1224_v59  ;;  %v1245_v17 = vmul.f32 %v1106_v5, %v2154_v52  ;;  %v1256_v16 = vsel %vm470_vm0, %v1246_v3, 0.0  ;;  %v1261_v10 = vmul.f32 %v1106_v5, %v2219_v32  ;;  %v1780_v57 = vpop.f32.mrf.mxu1  ;;  %v1272_v33 = vsel %vm470_vm0, %v1262_v6, 0.0  ;;  %v1765_v23 = vpop.f32.mrf.mxu0 }
 0x3d2   : > { %v1221_v37 = vsel %vm470_vm0, %v1213_v2, 0.0  ;;  %v1237_v24 = vsel %vm470_vm0, %v1229_v61, 0.0  ;;  %v1277_v14 = vmul.f32 %v1106_v5, %v2239_v40  ;;  %v1406_v45 = vmul.f32 %v1780_v57, %v2224_v20 }
 0x3d3   : > { %1222 = vadd.xlane.f32.xlu0 %v1221_v37  ;;  %v1253_v7 = vsel %vm470_vm0, %v1245_v17, 0.0  ;;  %v1269_v11 = vsel %vm470_vm0, %v1261_v10, 0.0  ;;  %v1166_v15 = vpop.f32.mrf.mxu1  ;;  %v1288_v44 = vsel %vm470_vm0, %v1278_v62, 0.0  ;;  %v1422_v26 = vmul.f32 %v1780_v57, %v2242_v25  ;;  %v1116_v35 = vpop.f32.mrf.mxu0 }
 0x3d4   : > { %v1405_v18 = vmul.f32 %v1166_v15, %v2219_v32  ;;  %v1285_v22 = vsel %vm470_vm0, %v1277_v14, 0.0  ;;  %v1416_v27 = vsel %vm470_vm0, %v1406_v45, 0.0  ;;  %v1421_v30 = vmul.f32 %v1166_v15, %v2239_v40 }
 0x3d5   : > { %1241 = vadd.xlane.f32.xlu1 %v1240_v28  ;;  %v1432_v39 = vsel %vm470_vm0, %v1422_v26, 0.0  ;;  %v1292_v42 = vmul.f32 %v1765_v23, %v2194_v21  ;;  %v1291_v47 = vmul.f32 %v1116_v35, %v2185_v60  ;;  %v1308_v49 = vmul.f32 %v1765_v23, %v2151_v51 }
 0x3d6   : > { %v1413_v34 = vsel %vm470_vm0, %v1405_v18, 0.0  ;;  %v1429_v46 = vsel %vm470_vm0, %v1421_v30, 0.0  ;;  %v1307_v53 = vmul.f32 %v1116_v35, %v2148_v50  ;;  %v1324_v54 = vmul.f32 %v1765_v23, %v2210_v8 }
 0x3d7   : > { %1238 = vadd.xlane.f32.xlu0 %v1237_v24  ;;  %v1298_v48 = vsel %vm470_vm0, %v1292_v42, 0.0  ;;  %v1295_v1 = vsel %vm470_vm0, %v1291_v47, 0.0  ;;  %v1314_v13 = vsel %vm470_vm0, %v1308_v49, 0.0  ;;  %v1323_v55 = vmul.f32 %v1116_v35, %v2207_v63  ;;  %v1768_v37 = vpop.f32.mrf.mxu0 }
 0x3d8   : > { %v1311_v60 = vsel %vm470_vm0, %v1307_v53, 0.0  ;;  %v1330_v5 = vsel %vm470_vm0, %v1324_v54, 0.0  ;;  %v1340_v59 = vmul.f32 %v1765_v23, %v2234_v41  ;;  %v1339_v9 = vmul.f32 %v1116_v35, %v2227_v4 }
 0x3d9   : > { %1257 = vadd.xlane.f32.xlu1 %v1256_v16  ;;  %v1327_v2 = vsel %vm470_vm0, %v1323_v55, 0.0  ;;  %v1126_v17 = vpop.f32.mrf.mxu0  ;;  %v1294_v6 = vmul.f32 %v1768_v37, %v2204_v36  ;;  %v1326_v36 = vmul.f32 %v1768_v37, %v2224_v20  ;;  %v1342_v18 = vmul.f32 %v1768_v37, %v2242_v25 }
 0x3da   : > { %v1346_v28 = vsel %vm470_vm0, %v1340_v59, 0.0  ;;  %v1343_v24 = vsel %vm470_vm0, %v1339_v9, 0.0  ;;  %v1293_v10 = vmul.f32 %v1126_v17, %v2197_v29  ;;  %v1325_v29 = vmul.f32 %v1126_v17, %v2219_v32 }
 0x3db   : > { %1254 = vadd.xlane.f32.xlu0 %v1253_v7  ;;  %v1304_v57 = vsel %vm470_vm0, %v1294_v6, 0.0  ;;  %v1771_v45 = vpop.f32.mrf.mxu0 }
 0x3dc   : > { %v1301_v62 = vsel %vm470_vm0, %v1293_v10, 0.0  ;;  %v1356_v26 = vmul.f32 %v1771_v45, %v2151_v51  ;;  %v1388_v51 = vmul.f32 %v1771_v45, %v2234_v41 }
 0x3dd   : > { %1273 = vadd.xlane.f32.xlu1 %v1272_v33  ;;  %v1310_v33 = vmul.f32 %v1768_v37, %v2173_v58  ;;  %v1136_v23 = vpop.f32.mrf.mxu0 }
 0x3de   : > { %v1362_v35 = vsel %vm470_vm0, %v1356_v26, 0.0  ;;  %v1371_v42 = vmul.f32 %v1136_v23, %v2207_v63 }
 0x3df   : > { %1270 = vadd.xlane.f32.xlu0 %v1269_v11  ;;  %v1309_v11 = vmul.f32 %v1126_v17, %v2154_v52  ;;  %v1320_v14 = vsel %vm470_vm0, %v1310_v33, 0.0 }
 0x3e1   : > { %1289 = vadd.xlane.f32.xlu1 %v1288_v44  ;;  %v1783_v19 = vpop.f32.mrf.mxu1  ;;  %v1317_v15 = vsel %vm470_vm0, %v1309_v11, 0.0  ;;  %v1336_v44 = vsel %vm470_vm0, %v1326_v36, 0.0 }
 0x3e2   : > { %v1436_v61 = vmul.f32 %v1783_v19, %v2234_v41  ;;  %v1333_v19 = vsel %vm470_vm0, %v1325_v29, 0.0 }
 0x3e3   : > { %1286 = vadd.xlane.f32.xlu0 %v1285_v22  ;;  %v1176_v31 = vpop.f32.mrf.mxu1  ;;  %v1341_v22 = vmul.f32 %v1126_v17, %v2239_v40 }
 0x3e4   : > { %v1435_v3 = vmul.f32 %v1176_v31, %v2227_v4  ;;  %v1442_v16 = vsel %vm470_vm0, %v1436_v61, 0.0  ;;  %v1355_v31 = vmul.f32 %v1136_v23, %v2148_v50  ;;  %v1387_v50 = vmul.f32 %v1136_v23, %v2227_v4 }
 0x3e5   : > { %1417 = vadd.xlane.f32.xlu1 %v1416_v27  ;;  %v1352_v27 = vsel %vm470_vm0, %v1342_v18, 0.0  ;;  %v1349_v30 = vsel %vm470_vm0, %v1341_v22, 0.0 }
 0x3e6   : > { %v1439_v7 = vsel %vm470_vm0, %v1435_v3, 0.0 }
 0x3e7   : > { %1414 = vadd.xlane.f32.xlu0 %v1413_v34  ;;  %v1372_v34 = vmul.f32 %v1771_v45, %v2210_v8 }
 0x3e8   : > { %v2301_v38 = vpop.f32.mrf.mxu1 }
 0x3e9   : > { %1433 = vadd.xlane.f32.xlu1 %v1432_v39  ;;  %v1359_v39 = vsel %vm470_vm0, %v1355_v31, 0.0  ;;  %v1378_v47 = vsel %vm470_vm0, %v1372_v34, 0.0 }
 0x3ea   : > { %v2305_v43 = vpop.f32.mrf.mxu1 }
 0x3eb   : > { %1430 = vadd.xlane.f32.xlu0 %v1429_v46  ;;  %v1774_v46 = vpop.f32.mrf.mxu0 }
 0x3ec   : > { %v1358_v8 = vmul.f32 %v1774_v46, %v2173_v58  ;;  %v1374_v41 = vmul.f32 %v1774_v46, %v2224_v20  ;;  %v1390_v58 = vmul.f32 %v1774_v46, %v2242_v25  ;;  %v1438_v20 = vmul.f32 %v2301_v38, %v2242_v25 }
 0x3ed   : > { %v1789_v0 = vpop.f32.mrf.mxu1  ;;  %1299 = vadd.xlane.f32.xlu1 %v1298_v48  ;;  %v1375_v48 = vsel %vm470_vm0, %v1371_v42, 0.0  ;;  %v1146_v49 = vpop.f32.mrf.mxu0 }
 0x3ee   : > { %v1394_v0 = vsel %vm470_vm0, %v1388_v51, 0.0  ;;  %v1357_v63 = vmul.f32 %v1146_v49, %v2154_v52  ;;  %v1368_v53 = vsel %vm470_vm0, %v1358_v8, 0.0  ;;  %v1389_v52 = vmul.f32 %v1146_v49, %v2239_v40 }
 0x3ef   : > { %1296 = vadd.xlane.f32.xlu0 %v1295_v1  ;;  %v1196_v21 = vpop.f32.mrf.mxu1  ;;  %v1391_v1 = vsel %vm470_vm0, %v1387_v50, 0.0  ;;  %v1448_v55 = vsel %vm470_vm0, %v1438_v20, 0.0 }
 0x3f0   : > { %v1373_v21 = vmul.f32 %v1146_v49, %v2219_v32  ;;  %v1365_v4 = vsel %vm470_vm0, %v1357_v63, 0.0  ;;  %v1437_v32 = vmul.f32 %v2305_v43, %v2239_v40 }
 0x3f1   : > { %1315 = vadd.xlane.f32.xlu1 %v1314_v13  ;;  %v1384_v13 = vsel %vm470_vm0, %v1374_v41, 0.0 }
 0x3f2   : > { %v1792_v12 = vpop.f32.mrf.mxu1  ;;  %v1381_v54 = vsel %vm470_vm0, %v1373_v21, 0.0 }
 0x3f3   : > { %1312 = vadd.xlane.f32.xlu0 %v1311_v60  ;;  %v1400_v12 = vsel %vm470_vm0, %v1390_v58, 0.0  ;;  %v1397_v60 = vsel %vm470_vm0, %v1389_v52, 0.0 }
 0x3f4   : > { %v1204_v56 = vpop.f32.mrf.mxu1 }
 0x3f5   : > { %1331 = vadd.xlane.f32.xlu1 %v1330_v5  ;;  %v1445_v56 = vsel %vm470_vm0, %v1437_v32, 0.0  ;;  %vm1510_vm0 = vcmask 113664  }
 0x3f7   : > { %1328 = vadd.xlane.f32.xlu0 %v1327_v2 }
 0x3f9   : > { %1347 = vadd.xlane.f32.xlu1 %v1346_v28 }
 0x3fb   : > { %1344 = vadd.xlane.f32.xlu0 %v1343_v24 }
 0x3fd   : > { %1443 = vadd.xlane.f32.xlu1 %v1442_v16 }
 0x3ff   : > { %1440 = vadd.xlane.f32.xlu0 %v1439_v7 }
 0x401   : > { %1305 = vadd.xlane.f32.xlu1 %v1304_v57 }
 0x403   : > { %1302 = vadd.xlane.f32.xlu0 %v1301_v62 }
 0x405   : > { %1321 = vadd.xlane.f32.xlu1 %v1320_v14 }
 0x407   : > { %1318 = vadd.xlane.f32.xlu0 %v1317_v15 }
 0x409   : > { %1337 = vadd.xlane.f32.xlu1 %v1336_v44 }
 0x40b   : > { %1334 = vadd.xlane.f32.xlu0 %v1333_v19 }
 0x40d   : > { %1353 = vadd.xlane.f32.xlu1 %v1352_v27 }
 0x40f   : > { %1350 = vadd.xlane.f32.xlu0 %v1349_v30 }
 0x411   : > { %1363 = vadd.xlane.f32.xlu1 %v1362_v35 }
 0x413   : > { %1360 = vadd.xlane.f32.xlu0 %v1359_v39 }
 0x415   : > { %1379 = vadd.xlane.f32.xlu1 %v1378_v47 }
 0x417   : > { %1376 = vadd.xlane.f32.xlu0 %v1375_v48 }
 0x419   : > { %1395 = vadd.xlane.f32.xlu1 %v1394_v0 }
 0x41b   : > { %1392 = vadd.xlane.f32.xlu0 %v1391_v1 }
 0x41d   : > { %1369 = vadd.xlane.f32.xlu1 %v1368_v53 }
 0x41f   : > { %1366 = vadd.xlane.f32.xlu0 %v1365_v4 }
 0x421   : > { %1385 = vadd.xlane.f32.xlu1 %v1384_v13 }
 0x423   : > { %1382 = vadd.xlane.f32.xlu0 %v1381_v54 }
 0x425   : > { %1401 = vadd.xlane.f32.xlu1 %v1400_v12 }
 0x427   : > { %1398 = vadd.xlane.f32.xlu0 %v1397_v60 }
 0x429   : > { %1449 = vadd.xlane.f32.xlu1 %v1448_v55 }
 0x42b   : > { %1446 = vadd.xlane.f32.xlu0 %v1445_v56 }
 0x437   : > { %v1236_v5 = vpop.xlane.xlu1 %1235  ;;  %v1220_v59 = vpop.xlane.xlu0 %1219 }
 0x438   : > { %v1452_v2 = vsel %vm568_vm2, %v1220_v59, %v1236_v5 }
 0x43b   : > { %v1252_v25 = vpop.xlane.xlu1 %1251  ;;  %v1233_v38 = vpop.xlane.xlu0 %1232 }
 0x43c   : > { %v1456_v9 = vsel %vm573_vm3, %v1452_v2, %v1252_v25 }
 0x43f   : > { %v1268_v37 = vpop.xlane.xlu1 %1267  ;;  %v1249_v43 = vpop.xlane.xlu0 %1248 }
 0x440   : > { %v1460_v40 = vsel %vm578_vm4, %v1456_v9, %v1268_v37 }
 0x443   : > { %v1284_v61 = vpop.xlane.xlu1 %1283  ;;  %v1265_v3 = vpop.xlane.xlu0 %1264 }
 0x444   : > { %v1464_v28 = vsel %vm583_vm5, %v1460_v40, %v1284_v61 }
 0x447   : > { %v2377_v24 = vpop.xlane.xlu1 %1411  ;;  %v1281_v16 = vpop.xlane.xlu0 %1280 }
 0x44b   : > { %v2379_v17 = vpop.xlane.xlu1 %1427  ;;  %v2383_v57 = vpop.xlane.xlu0 %1408 }
 0x44f   : > { %v1217_v6 = vpop.xlane.xlu1 %1216  ;;  %v2387_v11 = vpop.xlane.xlu0 %1424 }
 0x450   : > { %v1451_v7 = vsel %vm568_vm2, %v1217_v6, %v1233_v38 }
 0x451   : > { %v1455_v10 = vsel %vm573_vm3, %v1451_v7, %v1249_v43 }
 0x452   : > { %v1459_v33 = vsel %vm578_vm4, %v1455_v10, %v1265_v3 }
 0x453   : > { %v1463_v62 = vsel %vm583_vm5, %v1459_v33, %v1281_v16 }
 0x45a   : > { %v1226_v14 = vpop.xlane.xlu1 %1225 }
 0x45c   : > { %v1223_v36 = vpop.xlane.xlu0 %1222 }
 0x45e   : > { %v1242_v15 = vpop.xlane.xlu1 %1241 }
 0x45f   : > { %v1454_v29 = vsel %vm568_vm2, %v1226_v14, %v1242_v15 }
 0x460   : > { %v1239_v45 = vpop.xlane.xlu0 %1238 }
 0x461   : > { %v1453_v44 = vsel %vm568_vm2, %v1223_v36, %v1239_v45 }
 0x462   : > { %v1258_v18 = vpop.xlane.xlu1 %1257 }
 0x463   : > { %v1458_v19 = vsel %vm573_vm3, %v1454_v29, %v1258_v18 }
 0x464   : > { %v1255_v22 = vpop.xlane.xlu0 %1254 }
 0x465   : > { %v1457_v23 = vsel %vm573_vm3, %v1453_v44, %v1255_v22 }
 0x466   : > { %v1274_v26 = vpop.xlane.xlu1 %1273 }
 0x467   : > { %v2394_v27 = vsel %vm578_vm4, %v1458_v19, %v1274_v26 }
 0x468   : > { %v1271_v30 = vpop.xlane.xlu0 %1270 }
 0x469   : > { %v2397_v31 = vsel %vm578_vm4, %v1457_v23, %v1271_v30 }
 0x46a   : > { %v1290_v34 = vpop.xlane.xlu1 %1289 }
 0x46b   : > { %v1466_v29 = vsel %vm583_vm5, %v2394_v27, %v1290_v34 }
 0x46c   : > { %v2399_v35 = vpop.xlane.xlu0 %1286 }
 0x46e   : > { %v2401_v39 = vpop.xlane.xlu1 %1417 }
 0x470   : > { %v2403_v42 = vpop.xlane.xlu0 %1414 }
 0x472   : > { %v2405_v46 = vpop.xlane.xlu1 %1433 }
 0x474   : > { %v2407_v51 = vpop.xlane.xlu0 %1430 }
 0x476   : > { %v1300_v47 = vpop.xlane.xlu1 %1299 }
 0x477   : > { %v1468_v55 = vsel %vm588_vm6, %v1464_v28, %v1300_v47 }
 0x478   : > { %v1297_v48 = vpop.xlane.xlu0 %1296 }
 0x479   : > { %v1467_v59 = vsel %vm588_vm6, %v1463_v62, %v1297_v48 }
 0x47a   : > { %v1316_v50 = vpop.xlane.xlu1 %1315 }
 0x47b   : > { %v1472_v56 = vsel %vm594_vm7, %v1468_v55, %v1316_v50 }
 0x47c   : > { %v1313_v49 = vpop.xlane.xlu0 %1312 }
 0x47d   : > { %v1471_v25 = vsel %vm594_vm7, %v1467_v59, %v1313_v49 }
 0x47e   : > { %v1332_v8 = vpop.xlane.xlu1 %1331 }
 0x47f   : > { %v1477_v2 = vsel %vm1475_vm9, %v1472_v56, %v1332_v8 }
 0x480   : > { %v1329_v0 = vpop.xlane.xlu0 %1328 }
 0x481   : > { %v1476_v37 = vsel %vm1475_vm9, %v1471_v25, %v1329_v0 }
 0x482   : > { %v1348_v63 = vpop.xlane.xlu1 %1347 }
 0x483   : > { %v1482_v38 = vsel %vm1480_vm10, %v1477_v2, %v1348_v63 }
 0x484   : > { %v1345_v1 = vpop.xlane.xlu0 %1344 }
 0x485   : > { %v1481_v43 = vsel %vm1480_vm10, %v1476_v37, %v1345_v1 }
 0x486   : > { %v1444_v41 = vpop.xlane.xlu1 %1443 }
 0x488   : > { %v1441_v53 = vpop.xlane.xlu0 %1440 }
 0x48a   : > { %v1306_v21 = vpop.xlane.xlu1 %1305 }
 0x48c   : > { %v1303_v4 = vpop.xlane.xlu0 %1302 }
 0x48e   : > { %v1322_v58 = vpop.xlane.xlu1 %1321 }
 0x490   : > { %v1319_v13 = vpop.xlane.xlu0 %1318 }
 0x492   : > { %v1338_v52 = vpop.xlane.xlu1 %1337 }
 0x494   : > { %v1335_v54 = vpop.xlane.xlu0 %1334 }
 0x496   : > { %v1354_v20 = vpop.xlane.xlu1 %1353 }
 0x498   : > { %v1351_v12 = vpop.xlane.xlu0 %1350 }
 0x49a   : > { %v1364_v32 = vpop.xlane.xlu1 %1363 }
 0x49b   : > { %v1487_v40 = vsel %vm1485_vm11, %v1482_v38, %v1364_v32 }
 0x49c   : > { %v1361_v60 = vpop.xlane.xlu0 %1360 }
 0x49d   : > { %v1486_v3 = vsel %vm1485_vm11, %v1481_v43, %v1361_v60 }
 0x49e   : > { %v1380_v5 = vpop.xlane.xlu1 %1379 }
 0x49f   : > { %v1492_v61 = vsel %vm1490_vm12, %v1487_v40, %v1380_v5 }
 0x4a0   : > { %v1377_v9 = vpop.xlane.xlu0 %1376 }
 0x4a1   : > { %v1491_v6 = vsel %vm1490_vm12, %v1486_v3, %v1377_v9 }
 0x4a2   : > { %v1396_v28 = vpop.xlane.xlu1 %1395 }
 0x4a3   : > { %v1497_v16 = vsel %vm1495_vm13, %v1492_v61, %v1396_v28 }
 0x4a4   : > { %v1502_v7 = vsel %vm1500_vm14, %v1497_v16, %v2377_v24  ;;  %v1393_v10 = vpop.xlane.xlu0 %1392 }
 0x4a5   : > { %v1507_v33 = vsel %vm1505_vm15, %v1502_v7, %v2379_v17  ;;  %v1496_v62 = vsel %vm1495_vm13, %v1491_v6, %v1393_v10  ;;  %v1470_v17 = vsel %vm588_vm6, %v1466_v29, %v1306_v21 }
 0x4a6   : > { %v1501_v14 = vsel %vm1500_vm14, %v1496_v62, %v2383_v57  ;;  %v1370_v36 = vpop.xlane.xlu1 %1369  ;;  %v1512_v24 = vsel %vm1510_vm0, %v1507_v33, %v1444_v41  ;;  %v1465_v57 = vsel %vm583_vm5, %v2397_v31, %v2399_v35  ;;  %v1474_v18 = vsel %vm594_vm7, %v1470_v17, %v1322_v58 }
 0x4a7   : > { %v1506_v15 = vsel %vm1505_vm15, %v1501_v14, %v2387_v11  ;;  %1517 = vst.msk [vmem:[%s2428_s26 + $0x8] sm:$0xff] %vm1515_vm1, %v1512_v24  ;;  %v1469_v11 = vsel %vm588_vm6, %v1465_v57, %v1303_v4  ;;  %v1479_v22 = vsel %vm1475_vm9, %v1474_v18, %v1338_v52 }
 0x4a8   : > { %v1367_v45 = vpop.xlane.xlu0 %1366  ;;  %v1511_v44 = vsel %vm1510_vm0, %v1506_v15, %v1441_v53  ;;  %v1473_v23 = vsel %vm594_vm7, %v1469_v11, %v1319_v13  ;;  %v1484_v26 = vsel %vm1480_vm10, %v1479_v22, %v1354_v20 }
 0x4a9   : > { %1516 = vst.msk [vmem:[%s2428_s26] sm:$0xff] %vm1515_vm1, %v1511_v44  ;;  %v1478_v30 = vsel %vm1475_vm9, %v1473_v23, %v1335_v54  ;;  %v1489_v34 = vsel %vm1485_vm11, %v1484_v26, %v1370_v36 }
 0x4aa   : > { %v1386_v19 = vpop.xlane.xlu1 %1385  ;;  %v1483_v47 = vsel %vm1480_vm10, %v1478_v30, %v1351_v12 }
 0x4ab   : > { %v1494_v31 = vsel %vm1490_vm12, %v1489_v34, %v1386_v19  ;;  %v1488_v48 = vsel %vm1485_vm11, %v1483_v47, %v1367_v45 }
 0x4ac   : > { %v1383_v27 = vpop.xlane.xlu0 %1382 }
 0x4ad   : > { %v1493_v49 = vsel %vm1490_vm12, %v1488_v48, %v1383_v27 }
 0x4ae   : > { %v1402_v35 = vpop.xlane.xlu1 %1401 }
 0x4af   : > { %v1499_v50 = vsel %vm1495_vm13, %v1494_v31, %v1402_v35 }
 0x4b0   : > { %v1504_v8 = vsel %vm1500_vm14, %v1499_v50, %v2401_v39  ;;  %v1399_v0 = vpop.xlane.xlu0 %1398 }
 0x4b1   : > { %v1498_v63 = vsel %vm1495_vm13, %v1493_v49, %v1399_v0  ;;  %v1509_v1 = vsel %vm1505_vm15, %v1504_v8, %v2405_v46 }
 0x4b2   : > { %v1503_v41 = vsel %vm1500_vm14, %v1498_v63, %v2403_v42  ;;  %v1450_v53 = vpop.xlane.xlu1 %1449 }
 0x4b3   : > { %v1514_v21 = vsel %vm1510_vm0, %v1509_v1, %v1450_v53  ;;  %v1508_v4 = vsel %vm1505_vm15, %v1503_v41, %v2407_v51 }
 0x4b4   : > { %1519 = vst.msk [vmem:[%s2428_s26 + $0x18] sm:$0xff] %vm1515_vm1, %v1514_v21  ;;  %v1447_v58 = vpop.xlane.xlu0 %1446 }
 0x4b5   : > { %v1513_v39 = vsel %vm1510_vm0, %v1508_v4, %v1447_v58 }
 0x4b6   : > { %1518 = vst.msk [vmem:[%s2428_s26 + $0x10] sm:$0xff] %vm1515_vm1, %v1513_v39 }
 0x4b7 PF: > { %s19_s30 = sadd.s32 1, %s1857_s30  }
 0x4b8   : > { %p16_p4 = scmp.ge.s32.totalorder %s19_s30, 6  }
 0x4ba   :  { %18 = sbr.rel (!%p16_p4) target bundleno = 1 (0x1), region = 101 }

</bundles_post_ra>
